<compile_context>
chip_gen: v6e
topology: v6e:2x2x1
jax: 0.10.0
libtpu: 0.0.40
codegen_flags: <defaults>
</compile_context>

<pallas_src>
import functools

import jax
import jax.numpy as jnp
from jax.experimental import pallas as pl
from jax.experimental.pallas import tpu as pltpu


_MIN_PALLAS_BYTES = 1 << 20          # below this, plain XLA concat wins
_TARGET_CHUNK_BYTES = 1 << 20        # aim for ~1 MiB per sub-DMA
_NARROW_ROW_BYTES = 1024             # cat_dim=1 shards narrower than this go via VMEM
_VMEM_TILE_BUDGET_BYTES = 12 << 20   # in + out tiles, double-buffered (fits v7x)
_SUBLANE_MULT = {4: 8, 2: 16, 1: 32}


def _device_kind() -> str:
    try:
        return jax.devices()[0].device_kind.lower()
    except Exception:  # pragma: no cover
        return ""


# ---------------------------------------------------------------------------
# Path 3: HBM -> HBM chunked DMA merge.
# ---------------------------------------------------------------------------
def _merge_dma_kernel(*refs, world_size, chunk_groups, use_grid):
    """refs = (in_0..in_{W-1}, out_ref, dma_sems); everything lives in HBM.

    Each chunk is a static rectangular slice; all chunks of a group are
    started before any wait so the DMA engine overlaps them.
    """
    in_refs = refs[:world_size]
    out_ref = refs[world_size]
    sems = refs[world_size + 1]

    def run_group(chunks):
        copies = []
        for (sem_idx, w, src_row, n_rows, dst_row, dst_col, n_cols, full_w) in chunks:
            src = in_refs[w].at[pl.ds(src_row, n_rows), :]
            if full_w:
                # cat_dim == 0: contiguous row range of the output.
                dst = out_ref.at[pl.ds(dst_row, n_rows), :]
            else:
                # cat_dim == 1 (wide shards): strided rectangular column slice.
                dst = out_ref.at[pl.ds(dst_row, n_rows), pl.ds(dst_col, n_cols)]
            cp = pltpu.make_async_copy(src, dst, sems.at[sem_idx])
            cp.start()
            copies.append(cp)
        for cp in copies:
            cp.wait()

    if use_grid:
        # v7x: split the chunk list across both TensorCores ("parallel" grid).
        gid = pl.program_id(0)
        for g, chunks in enumerate(chunk_groups):
            if chunks:
                pl.when(gid == g)(functools.partial(run_group, chunks))
    else:
        run_group(chunk_groups[0])


def _plan_chunks(cat_dim, cat_sizes, non_cat_size, itemsize, max_chunks, num_groups):
    """Split each shard copy into sublane-aligned row chunks of ~1 MiB.

    Returns (chunk_groups, total_chunks).  Chunk entry:
      (sem_idx, shard, src_row, n_rows, dst_row, dst_col, n_cols, full_width)
    """
    world_size = len(cat_sizes)
    sub = _SUBLANE_MULT.get(itemsize, 8)
    per_shard_cap = max(1, max_chunks // world_size)

    chunks = []
    col_off = 0
    row_off = 0
    for w, cs in enumerate(cat_sizes):
        if cat_dim == 0:
            rows, width, full_w = cs, non_cat_size, True
        else:
            rows, width, full_w = non_cat_size, cs, False
        shard_bytes = rows * width * itemsize
        n_chunks = max(1, min(shard_bytes // _TARGET_CHUNK_BYTES, per_shard_cap))
        rows_per_chunk = -(-rows // n_chunks)                       # ceil
        rows_per_chunk = max(sub, -(-rows_per_chunk // sub) * sub)  # keep offsets aligned
        r = 0
        while r < rows:
            nr = min(rows_per_chunk, rows - r)
            if cat_dim == 0:
                chunks.append((len(chunks), w, r, nr, row_off + r, 0, width, True))
            else:
                chunks.append((len(chunks), w, r, nr, r, col_off, width, False))
            r += nr
        col_off += cs
        row_off += cs

    groups = [[] for _ in range(num_groups)]
    for i, c in enumerate(chunks):
        groups[i % num_groups].append(c)
    return tuple(tuple(g) for g in groups), len(chunks)


# ---------------------------------------------------------------------------
# Path 2: narrow cat_dim=1 shards, row-tiled VMEM assembly (lane-dense writes).
# ---------------------------------------------------------------------------
def _narrow_cat1_kernel(*refs, world_size, col_offsets, col_sizes):
    in_refs = refs[:world_size]
    out_ref = refs[world_size]
    for w in range(world_size):
        out_ref[:, pl.ds(col_offsets[w], col_sizes[w])] = in_refs[w][...]


# ---------------------------------------------------------------------------
# Wrapper (path selection, alignment / size gates).
# ---------------------------------------------------------------------------
def embeddings_all_to_one(tensors, cat_dim: int, *, force_pallas: bool = False,
                          num_groups=None):
    """JAX/Pallas equivalent of EmbeddingsAllToOne.forward (local merge).

    Args:
        tensors: list of 2-D arrays (all already on this device).
        cat_dim: 1 for pooled embeddings, 0 for sequence embeddings.
        force_pallas: skip the small-size XLA fallback (used for testing).
        num_groups: override the TensorCore split of the DMA path (None = auto).
    """
    world_size = len(tensors)
    assert world_size >= 1
    assert cat_dim in (0, 1)
    dtype = tensors[0].dtype
    itemsize = jnp.dtype(dtype).itemsize
    non_cat_dim = 1 - cat_dim
    non_cat_size = int(tensors[0].shape[non_cat_dim])
    for t in tensors:
        assert t.ndim == 2 and t.dtype == dtype
        assert int(t.shape[non_cat_dim]) == non_cat_size
    cat_sizes = tuple(int(t.shape[cat_dim]) for t in tensors)
    total_cat = sum(cat_sizes)

    if world_size == 1:
        return tensors[0]

    sub = _SUBLANE_MULT.get(itemsize, 8)
    total_bytes = total_cat * non_cat_size * itemsize

    # Alignment gate: shard boundaries must land on HBM tile boundaries
    # (128 lanes for cat_dim=1 column slices, 8/16/32 sublanes by dtype for
    # cat_dim=0 row offsets), otherwise the copies degrade to masked DMAs.
    if cat_dim == 1:
        aligned = all(cs % 128 == 0 for cs in cat_sizes)
    else:
        aligned = all(cs % sub == 0 for cs in cat_sizes)

    # Size gate: tiny merges are pure launch/DMA overhead, and keeping them in
    # XLA lets the concat fuse into downstream consumers.
    if (not aligned) or (total_bytes < _MIN_PALLAS_BYTES and not force_pallas):
        # TODO(synk): could pad unaligned shards to tile boundaries instead.
        return jnp.concatenate(tensors, axis=cat_dim)

    if cat_dim == 0:
        out_shape = (total_cat, non_cat_size)
    else:
        out_shape = (non_cat_size, total_cat)

    # Memory-only op: advertise traffic so XLA can schedule around it.
    cost = pl.CostEstimate(flops=0, transcendentals=0, bytes_accessed=2 * total_bytes)
    kind = _device_kind()

    # ---- Path 2: narrow pooled shards -> VMEM row-tiled assembly ----------
    if cat_dim == 1 and max(cat_sizes) * itemsize < _NARROW_ROW_BYTES:
        rows = non_cat_size
        row_tile_bytes = 4 * total_cat * itemsize  # in+out tiles, double-buffered
        tile_rows = max(sub, (_VMEM_TILE_BUDGET_BYTES // row_tile_bytes) // sub * sub)
        tile_rows = min(tile_rows, rows)
        if rows % sub != 0:
            tile_rows = rows  # single full-extent block (small / odd batch)

        col_offsets = []
        off = 0
        for cs in cat_sizes:
            col_offsets.append(off)
            off += cs

        kernel = functools.partial(
            _narrow_cat1_kernel, world_size=world_size,
            col_offsets=tuple(col_offsets), col_sizes=cat_sizes)
        return pl.pallas_call(
            kernel,
            out_shape=jax.ShapeDtypeStruct(out_shape, dtype),
            grid=(pl.cdiv(rows, tile_rows),),
            in_specs=[pl.BlockSpec((tile_rows, cs), lambda i: (i, 0))
                      for cs in cat_sizes],
            out_specs=pl.BlockSpec((tile_rows, total_cat), lambda i: (i, 0)),
            compiler_params=pltpu.CompilerParams(
                dimension_semantics=("parallel",),
                vmem_limit_bytes=32 * 1024 * 1024),
            cost_estimate=cost,
        )(*tensors)

    # ---- Path 3: HBM -> HBM chunked DMA ------------------------------------
    if num_groups is None:
        num_groups = 2 if "v7" in kind else 1   # v7x: use both TensorCores
    max_chunks = 8 if "v5" in kind else 16      # v5e: fewer, larger copies
    chunk_groups, total_chunks = _plan_chunks(
        cat_dim, cat_sizes, non_cat_size, itemsize, max_chunks, num_groups)
    use_grid = num_groups > 1

    kernel = functools.partial(
        _merge_dma_kernel, world_size=world_size,
        chunk_groups=chunk_groups, use_grid=use_grid)

    call_kwargs = dict(
        out_shape=jax.ShapeDtypeStruct(out_shape, dtype),
        in_specs=[pl.BlockSpec(memory_space=pl.ANY)] * world_size,
        out_specs=pl.BlockSpec(memory_space=pl.ANY),
        scratch_shapes=[pltpu.SemaphoreType.DMA((total_chunks,))],
        cost_estimate=cost,
    )
    if use_grid:
        call_kwargs["grid"] = (num_groups,)
        call_kwargs["compiler_params"] = pltpu.CompilerParams(
            dimension_semantics=("parallel",), has_side_effects=True)
    else:
        call_kwargs["compiler_params"] = pltpu.CompilerParams(has_side_effects=True)

    return pl.pallas_call(kernel, **call_kwargs)(*tensors)


if __name__ == "__main__":
    key = jax.random.PRNGKey(0)
    world_size = 4

    def make_shards(k, shape, n):
        return [jax.random.normal(kk, shape, dtype=jnp.float32)
                for kk in jax.random.split(k, n)]

    k1, k2, k3, k4 = jax.random.split(key, 4)

    # 1) pooled (cat_dim=1), narrow shards -> VMEM row-tiled path.
    shards = make_shards(k1, (64, 128), world_size)
    out = jax.block_until_ready(
        embeddings_all_to_one(shards, cat_dim=1, force_pallas=True))
    assert out.shape == (64, world_size * 128)
    assert jnp.array_equal(out, jnp.concatenate(shards, axis=1))

    # 2) pooled (cat_dim=1), wide shards -> HBM->HBM chunked DMA path.
    shards = make_shards(k2, (64, 512), world_size)
    out = jax.block_until_ready(
        embeddings_all_to_one(shards, cat_dim=1, force_pallas=True))
    assert jnp.array_equal(out, jnp.concatenate(shards, axis=1))

    # 3) sequence (cat_dim=0) -> contiguous-row chunked DMA path.
    shards = make_shards(k3, (64, 256), world_size)
    out = jax.block_until_ready(
        embeddings_all_to_one(shards, cat_dim=0, force_pallas=True))
    assert out.shape == (world_size * 64, 256)
    assert jnp.array_equal(out, jnp.concatenate(shards, axis=0))

    # 4) compile-test the dual-TensorCore (v7x) grid split on whatever chip
    #    this runs on (on 1-TC chips it is just two sequential grid steps).
    out = jax.block_until_ready(
        embeddings_all_to_one(shards, cat_dim=0, force_pallas=True, num_groups=2))
    assert jnp.array_equal(out, jnp.concatenate(shards, axis=0))

    # 5) unaligned shard widths take the XLA concat fallback.
    shards = make_shards(k4, (8, 100), world_size)
    out = jax.block_until_ready(embeddings_all_to_one(shards, cat_dim=1))
    assert jnp.array_equal(out, jnp.concatenate(shards, axis=1))

    # TODO(synk): the real module also moves shards across devices (fbgemm
    # merge_pooled_embeddings all-to-one); here shards are already local, so
    # only the merge/concat data movement is modeled.
    print("KERNEL_OK")
</pallas_src>

<mosaic_0001>
module attributes {stable_mosaic.version = 11 : i64} {
  func.func @_narrow_cat1_kernel(%arg0: i32, %arg1: memref<64x128xf32, #tpu.memory_space<vmem>>, %arg2: memref<64x128xf32, #tpu.memory_space<vmem>>, %arg3: memref<64x128xf32, #tpu.memory_space<vmem>>, %arg4: memref<64x128xf32, #tpu.memory_space<vmem>>, %arg5: memref<64x512xf32, #tpu.memory_space<vmem>>) attributes {dimension_semantics = [#tpu.dimension_semantics<parallel>], iteration_bounds = array<i64: 1>, scalar_prefetch = 0 : i64, scratch_operands = 0 : i64, tpu.core_type = #tpu.core_type<tc>, window_params = [{transform_indices = @transform_0, window_bounds = array<i64: 64, 128>}, {transform_indices = @transform_1, window_bounds = array<i64: 64, 128>}, {transform_indices = @transform_2, window_bounds = array<i64: 64, 128>}, {transform_indices = @transform_3, window_bounds = array<i64: 64, 128>}, {transform_indices = @transform_4, window_bounds = array<i64: 64, 512>}]} {
    %c0 = arith.constant 0 : index
    %c0_0 = arith.constant 0 : index
    %0 = vector.load %arg1[%c0, %c0_0] : memref<64x128xf32, #tpu.memory_space<vmem>>, vector<64x128xf32>
    %c0_1 = arith.constant 0 : index
    %c0_2 = arith.constant 0 : index
    %1 = vector.load %arg5[%c0_1, %c0_2] : memref<64x512xf32, #tpu.memory_space<vmem>>, vector<64x128xf32>
    tpu.vector_store %arg5[%c0_1, %c0_2], %0 {strides = array<i32>} : memref<64x512xf32, #tpu.memory_space<vmem>>, vector<64x128xf32>,
    %c0_3 = arith.constant 0 : index
    %c0_4 = arith.constant 0 : index
    %2 = vector.load %arg2[%c0_3, %c0_4] : memref<64x128xf32, #tpu.memory_space<vmem>>, vector<64x128xf32>
    %c0_5 = arith.constant 0 : index
    %c128 = arith.constant 128 : index
    %3 = vector.load %arg5[%c0_5, %c128] : memref<64x512xf32, #tpu.memory_space<vmem>>, vector<64x128xf32>
    tpu.vector_store %arg5[%c0_5, %c128], %2 {strides = array<i32>} : memref<64x512xf32, #tpu.memory_space<vmem>>, vector<64x128xf32>,
    %c0_6 = arith.constant 0 : index
    %c0_7 = arith.constant 0 : index
    %4 = vector.load %arg3[%c0_6, %c0_7] : memref<64x128xf32, #tpu.memory_space<vmem>>, vector<64x128xf32>
    %c0_8 = arith.constant 0 : index
    %c256 = arith.constant 256 : index
    %5 = vector.load %arg5[%c0_8, %c256] : memref<64x512xf32, #tpu.memory_space<vmem>>, vector<64x128xf32>
    tpu.vector_store %arg5[%c0_8, %c256], %4 {strides = array<i32>} : memref<64x512xf32, #tpu.memory_space<vmem>>, vector<64x128xf32>,
    %c0_9 = arith.constant 0 : index
    %c0_10 = arith.constant 0 : index
    %6 = vector.load %arg4[%c0_9, %c0_10] : memref<64x128xf32, #tpu.memory_space<vmem>>, vector<64x128xf32>
    %c0_11 = arith.constant 0 : index
    %c384 = arith.constant 384 : index
    %7 = vector.load %arg5[%c0_11, %c384] : memref<64x512xf32, #tpu.memory_space<vmem>>, vector<64x128xf32>
    tpu.vector_store %arg5[%c0_11, %c384], %6 {strides = array<i32>} : memref<64x512xf32, #tpu.memory_space<vmem>>, vector<64x128xf32>,
    return
  }
  func.func @transform_0(%arg0: i32) -> (i32, i32) {
    %c0_i32 = arith.constant 0 : i32
    %c0_i32_0 = arith.constant 0 : i32
    return %arg0, %c0_i32 : i32, i32
  }
  func.func @transform_1(%arg0: i32) -> (i32, i32) {
    %c0_i32 = arith.constant 0 : i32
    %c0_i32_0 = arith.constant 0 : i32
    return %arg0, %c0_i32 : i32, i32
  }
  func.func @transform_2(%arg0: i32) -> (i32, i32) {
    %c0_i32 = arith.constant 0 : i32
    %c0_i32_0 = arith.constant 0 : i32
    return %arg0, %c0_i32 : i32, i32
  }
  func.func @transform_3(%arg0: i32) -> (i32, i32) {
    %c0_i32 = arith.constant 0 : i32
    %c0_i32_0 = arith.constant 0 : i32
    return %arg0, %c0_i32 : i32, i32
  }
  func.func @transform_4(%arg0: i32) -> (i32, i32) {
    %c0_i32 = arith.constant 0 : i32
    %c0_i32_0 = arith.constant 0 : i32
    return %arg0, %c0_i32 : i32, i32
  }
}

</mosaic_0001>

<bundles_post_ra>
// kernel: tpu_custom_call.1
= control target key start
LH: loop header
LB: loop body
LE: loop exit
PB: predicated region body
PF: predicated region fallthrough
CT: control target
= control target key end

     0   :  { %9 = vsyncpa [#allocation3], 0  ;;  %s334_s0 = inlined_call_operand.hbm [shape: f32[64,128], index: 0, kind: input, shape index: {}]   ;;  %s335_s1 = inlined_call_operand.hbm [shape: f32[64,128], index: 1, kind: input, shape index: {}]   ;;  %s336_s2 = inlined_call_operand.hbm [shape: f32[64,128], index: 2, kind: input, shape index: {}]   ;;  %s337_s3 = inlined_call_operand.hbm [shape: f32[64,128], index: 3, kind: input, shape index: {}]   ;;  %s338_s4 = inlined_call_operand.hbm [shape: f32[64,512], index: 4, kind: output, shape index: {}]  }
   0x1   :  { %10 = vsyncpa [#allocation6], 0 }
   0x2   :  { %11 = vsyncpa [#allocation9], 0 }
   0x3   :  { %12 = vsyncpa [#allocation4], 0  ;;  %s273_s15 = smov [#allocation5]   ;;  %s274_s17 = smov [#allocation2]  }
   0x4   :  { %s30_s16 = sshll.u32 %s273_s15, 4  ;;  %s18_s18 = sshll.u32 %s274_s17, 4  ;;  %s31_s16 = int_to_ptr.vmem [resolvable:$true] %s30_s16  ;;  %s19_s18 = int_to_ptr.vmem [resolvable:$true] %s18_s18 }
   0x5   :  { %s173_s19 = scalar_lea.vmem %s31_s16, 1024  ;;  %p178_p1 = scmp.lt.s32.totalorder %s31_s16, %s31_s16 }
   0x6   :  { %p174_p0 = scmp.ne.s32.totalorder %s31_s16, %s173_s19  ;;  %p179_p2 = scmp.lt.s32.totalorder %s173_s19, %s173_s19 }
   0x8   :  { %p180_p3 = por %p179_p2, %p178_p1 }
   0xa   :  { %p181_p4 = pnand %p180_p3, %p174_p0 }
   0xc   :  { %184 = shalt.err (!%p181_p4)
}
   0xd   :  { %s275_s20 = smov 128   ;;  %s276_s21 = smov 8  }
   0xe   :  { %36 = dma.hbm_to_vmem [thread:$0]  %s335_s1, 1024, %s31_s16, [#allocation6], %s275_s20, %s275_s20, %s276_s21  }
   0xf   :  { %s193_s24 = scalar_lea.vmem %s19_s18, 1024  ;;  %p198_p6 = scmp.lt.s32.totalorder %s19_s18, %s19_s18 }
  0x10   :  { %p194_p5 = scmp.ne.s32.totalorder %s19_s18, %s193_s24  ;;  %p199_p7 = scmp.lt.s32.totalorder %s193_s24, %s193_s24 }
  0x12   :  { %p200_p8 = por %p199_p7, %p198_p6 }
  0x14   :  { %p201_p9 = pnand %p200_p8, %p194_p5 }
  0x16   :  { %204 = shalt.err (!%p201_p9)
}
  0x17   :  { %24 = dma.hbm_to_vmem [thread:$0]  %s334_s0, 1024, %s19_s18, [#allocation3], %s275_s20, %s275_s20, %s276_s21  }
  0x18   :  { %s277_s27 = smov [#allocation7]   ;;  %s278_s29 = smov [#allocation8]  }
  0x19   :  { %s42_s28 = sshll.u32 %s277_s27, 4  ;;  %s54_s30 = sshll.u32 %s278_s29, 4  ;;  %s43_s28 = int_to_ptr.vmem [resolvable:$true] %s42_s28  ;;  %s55_s30 = int_to_ptr.vmem [resolvable:$true] %s54_s30 }
  0x1a   :  { %s213_s1 = scalar_lea.vmem %s43_s28, 1024  ;;  %p218_p11 = scmp.lt.s32.totalorder %s43_s28, %s43_s28 }
  0x1b   :  { %p214_p10 = scmp.ne.s32.totalorder %s43_s28, %s213_s1  ;;  %p219_p12 = scmp.lt.s32.totalorder %s213_s1, %s213_s1 }
  0x1d   :  { %p220_p13 = por %p219_p12, %p218_p11 }
  0x1f   :  { %p221_p0 = pnand %p220_p13, %p214_p10 }
  0x21   :  { %224 = shalt.err (!%p221_p0)
}
  0x22   :  { %48 = dma.hbm_to_vmem [thread:$0]  %s336_s2, 1024, %s43_s28, [#allocation6], %s275_s20, %s275_s20, %s276_s21  }
  0x23   :  { %s233_s0 = scalar_lea.vmem %s55_s30, 1024  ;;  %p238_p2 = scmp.lt.s32.totalorder %s55_s30, %s55_s30 }
  0x24   :  { %p234_p1 = scmp.ne.s32.totalorder %s55_s30, %s233_s0  ;;  %p239_p3 = scmp.lt.s32.totalorder %s233_s0, %s233_s0 }
  0x26   :  { %p240_p4 = por %p239_p3, %p238_p2 }
  0x28   :  { %p241_p5 = pnand %p240_p4, %p234_p1 }
  0x2a   :  { %244 = shalt.err (!%p241_p5)
}
  0x2b   :  { %60 = dma.hbm_to_vmem [thread:$0]  %s337_s3, 1024, %s55_s30, [#allocation9], %s275_s20, %s275_s20, %s276_s21  }
  0x2c   :  { %265 = dma.done.wait [#allocation3], 1024  }
  0x2d   :  { %266 = vsyncadd [#allocation3], 4294966272 }
  0x2e   :  { %267 = dma.done.wait [#allocation6], 2048  }
  0x2f   :  { %268 = vsyncadd [#allocation6], 4294965248 }
  0x30   :  { %269 = dma.done.wait [#allocation9], 1024  }
  0x31   :  { %270 = vsyncadd [#allocation9], 4294966272  ;;  %v73_v0 = vld [vmem:[#allocation2] sm:$0xff]  ;;  %v74_v1 = vld [vmem:[#allocation2 + $0x8] sm:$0xff]  ;;  %s279_s2 = smov [#allocation10]  }
  0x32   :  { %v75_v2 = vld [vmem:[#allocation2 + $0x10] sm:$0xff]  ;;  %81 = vst [vmem:[#allocation10] sm:$0xff] %v73_v0  ;;  %82 = vst [vmem:[#allocation10 + $0x20] sm:$0xff] %v74_v1  ;;  %v76_v3 = vld [vmem:[#allocation2 + $0x18] sm:$0xff]  ;;  %s142_s3 = sshll.u32 %s279_s2, 4  ;;  %s143_s3 = int_to_ptr.vmem [resolvable:$true] %s142_s3 }
  0x33   :  { %83 = vst [vmem:[#allocation10 + $0x40] sm:$0xff] %v75_v2  ;;  %v77_v4 = vld [vmem:[#allocation2 + $0x20] sm:$0xff]  ;;  %v78_v5 = vld [vmem:[#allocation2 + $0x28] sm:$0xff]  ;;  %84 = vst [vmem:[#allocation10 + $0x60] sm:$0xff] %v76_v3  ;;  %s245_s9 = scalar_lea.vmem %s143_s3, 4096  ;;  %p250_p7 = scmp.lt.s32.totalorder %s143_s3, %s143_s3 }
  0x34   :  { %85 = vst [vmem:[#allocation10 + $0x80] sm:$0xff] %v77_v4  ;;  %86 = vst [vmem:[#allocation10 + $0xa0] sm:$0xff] %v78_v5  ;;  %v79_v6 = vld [vmem:[#allocation2 + $0x30] sm:$0xff]  ;;  %v80_v7 = vld [vmem:[#allocation2 + $0x38] sm:$0xff]  ;;  %p246_p6 = scmp.ne.s32.totalorder %s143_s3, %s245_s9  ;;  %p251_p8 = scmp.lt.s32.totalorder %s245_s9, %s245_s9 }
  0x35   :  { %v89_v8 = vld [vmem:[#allocation5] sm:$0xff]  ;;  %87 = vst [vmem:[#allocation10 + $0xc0] sm:$0xff] %v79_v6  ;;  %88 = vst [vmem:[#allocation10 + $0xe0] sm:$0xff] %v80_v7  ;;  %v90_v9 = vld [vmem:[#allocation5 + $0x8] sm:$0xff] }
  0x36   :  { %97 = vst [vmem:[#allocation10 + $0x8] sm:$0xff] %v89_v8  ;;  %v91_v10 = vld [vmem:[#allocation5 + $0x10] sm:$0xff]  ;;  %v92_v11 = vld [vmem:[#allocation5 + $0x18] sm:$0xff]  ;;  %98 = vst [vmem:[#allocation10 + $0x28] sm:$0xff] %v90_v9  ;;  %p252_p9 = por %p251_p8, %p250_p7 }
  0x37   :  { %99 = vst [vmem:[#allocation10 + $0x48] sm:$0xff] %v91_v10  ;;  %100 = vst [vmem:[#allocation10 + $0x68] sm:$0xff] %v92_v11  ;;  %v93_v12 = vld [vmem:[#allocation5 + $0x20] sm:$0xff]  ;;  %v94_v13 = vld [vmem:[#allocation5 + $0x28] sm:$0xff] }
  0x38   :  { %v95_v14 = vld [vmem:[#allocation5 + $0x30] sm:$0xff]  ;;  %101 = vst [vmem:[#allocation10 + $0x88] sm:$0xff] %v93_v12  ;;  %102 = vst [vmem:[#allocation10 + $0xa8] sm:$0xff] %v94_v13  ;;  %v96_v15 = vld [vmem:[#allocation5 + $0x38] sm:$0xff]  ;;  %p253_p10 = pnand %p252_p9, %p246_p6 }
  0x39   :  { %103 = vst [vmem:[#allocation10 + $0xc8] sm:$0xff] %v95_v14  ;;  %v105_v16 = vld [vmem:[#allocation7] sm:$0xff]  ;;  %v106_v17 = vld [vmem:[#allocation7 + $0x8] sm:$0xff]  ;;  %104 = vst [vmem:[#allocation10 + $0xe8] sm:$0xff] %v96_v15 }
  0x3a   :  { %113 = vst [vmem:[#allocation10 + $0x10] sm:$0xff] %v105_v16  ;;  %114 = vst [vmem:[#allocation10 + $0x30] sm:$0xff] %v106_v17  ;;  %v107_v18 = vld [vmem:[#allocation7 + $0x10] sm:$0xff]  ;;  %v108_v19 = vld [vmem:[#allocation7 + $0x18] sm:$0xff] }
  0x3b   :  { %v109_v20 = vld [vmem:[#allocation7 + $0x20] sm:$0xff]  ;;  %115 = vst [vmem:[#allocation10 + $0x50] sm:$0xff] %v107_v18  ;;  %116 = vst [vmem:[#allocation10 + $0x70] sm:$0xff] %v108_v19  ;;  %v110_v21 = vld [vmem:[#allocation7 + $0x28] sm:$0xff] }
  0x3c   :  { %117 = vst [vmem:[#allocation10 + $0x90] sm:$0xff] %v109_v20  ;;  %v111_v22 = vld [vmem:[#allocation7 + $0x30] sm:$0xff]  ;;  %v112_v23 = vld [vmem:[#allocation7 + $0x38] sm:$0xff]  ;;  %118 = vst [vmem:[#allocation10 + $0xb0] sm:$0xff] %v110_v21 }
  0x3d   :  { %119 = vst [vmem:[#allocation10 + $0xd0] sm:$0xff] %v111_v22  ;;  %120 = vst [vmem:[#allocation10 + $0xf0] sm:$0xff] %v112_v23  ;;  %v121_v24 = vld [vmem:[#allocation8] sm:$0xff]  ;;  %v122_v25 = vld [vmem:[#allocation8 + $0x8] sm:$0xff] }
  0x3e   :  { %v123_v26 = vld [vmem:[#allocation8 + $0x10] sm:$0xff]  ;;  %129 = vst [vmem:[#allocation10 + $0x18] sm:$0xff] %v121_v24  ;;  %130 = vst [vmem:[#allocation10 + $0x38] sm:$0xff] %v122_v25  ;;  %v124_v27 = vld [vmem:[#allocation8 + $0x18] sm:$0xff] }
  0x3f   :  { %131 = vst [vmem:[#allocation10 + $0x58] sm:$0xff] %v123_v26  ;;  %v125_v28 = vld [vmem:[#allocation8 + $0x20] sm:$0xff]  ;;  %v126_v29 = vld [vmem:[#allocation8 + $0x28] sm:$0xff]  ;;  %132 = vst [vmem:[#allocation10 + $0x78] sm:$0xff] %v124_v27 }
  0x40   :  { %133 = vst [vmem:[#allocation10 + $0x98] sm:$0xff] %v125_v28  ;;  %134 = vst [vmem:[#allocation10 + $0xb8] sm:$0xff] %v126_v29  ;;  %v127_v30 = vld [vmem:[#allocation8 + $0x30] sm:$0xff]  ;;  %v128_v31 = vld [vmem:[#allocation8 + $0x38] sm:$0xff] }
  0x41   :  { %135 = vst [vmem:[#allocation10 + $0xd8] sm:$0xff] %v127_v30  ;;  %136 = vst [vmem:[#allocation10 + $0xf8] sm:$0xff] %v128_v31 }
  0x42   :  { %256 = shalt.err (!%p253_p10)
}
  0x43   :  { %s280_s10 = smov 512   ;;  %s281_s11 = smov 32  }
  0x44   :  { %148 = dma.vmem_to_hbm [thread:$0]  %s143_s3, 4096, %s338_s4, [#allocation4], %s280_s10, %s280_s10, %s281_s11  }
  0x45   :  { %271 = dma.done.wait [#allocation4], 4096  }
  0x46   :  { %272 = vsyncadd [#allocation4], 4294963200 }
  0x47   :  { %152 = vsyncpa [#allocation3], 1 }
  0x48   :  { %153 = vsyncpa [#allocation6], 1 }
  0x49   :  { %154 = vsyncpa [#allocation9], 1 }
  0x4a   :  { %155 = vsyncpa [#allocation4], 1 }

</bundles_post_ra>
